<compile_context>
chip_gen: v5e
topology: v5e:2x2
jax: 0.10.0
libtpu: 0.0.40
codegen_flags: <defaults>
</compile_context>

<pallas_src>
import functools

import jax
import jax.numpy as jnp
from jax.experimental import pallas as pl
from jax.experimental.pallas import tpu as pltpu


def _attention_kernel(*refs, num_heads, d_head, has_mask):
    if has_mask:
        (left_ref, right_ref, wq_ref, wk_ref, wv_ref, wo_ref, bo_ref,
         mask_ref, o_ref, k_scr, v_scr) = refs
    else:
        (left_ref, right_ref, wq_ref, wk_ref, wv_ref, wo_ref, bo_ref,
         o_ref, k_scr, v_scr) = refs
        mask_ref = None

    H, Dh = num_heads, d_head
    D = H * Dh
    scale = Dh ** (-0.5)

    # --- k/v projection: once per batch element (first M tile), cached
    # head-major in bf16 VMEM scratch and reused by every query tile. ---
    @pl.when(pl.program_id(1) == 0)
    def _project_kv():
        xc = right_ref[0].astype(jnp.bfloat16)                         # (N, Dc)
        k = jnp.dot(xc, wk_ref[...], preferred_element_type=jnp.float32)  # (N, D)
        v = jnp.dot(xc, wv_ref[...], preferred_element_type=jnp.float32)  # (N, D)
        n = k.shape[0]
        k_scr[...] = jnp.transpose(k.reshape(n, H, Dh), (1, 0, 2)).astype(jnp.bfloat16)
        v_scr[...] = jnp.transpose(v.reshape(n, H, Dh), (1, 0, 2)).astype(jnp.bfloat16)

    # --- Q projection for this (batch, M-tile) block. ---
    xq = left_ref[0].astype(jnp.bfloat16)                              # (tm, Dq)
    q = jnp.dot(xq, wq_ref[...], preferred_element_type=jnp.float32)   # (tm, D)
    tm = q.shape[0]
    qh = jnp.transpose(q.reshape(tm, H, Dh), (1, 0, 2)).astype(jnp.bfloat16)  # (H,tm,Dh)

    # --- Scores for all heads at once (batched, head-leading MXU matmul). ---
    s = jnp.einsum('hmd,hnd->hmn', qh, k_scr[...],
                   preferred_element_type=jnp.float32) * scale         # (H, tm, N) f32
    if mask_ref is not None:
        keep = mask_ref[0] != 0                                        # (tm, N) bool
        # Fully-masked rows yield a uniform softmax over -1e7 logits (mean of V),
        # matching the torch -10000000.0 semantics.
        s = jnp.where(keep[None, :, :], s, -10000000.0)

    # --- f32 softmax over the context axis; EUP approx reciprocal denominator. ---
    s = s - jnp.max(s, axis=-1, keepdims=True)
    p = jnp.exp(s)
    p = p * pl.reciprocal(jnp.sum(p, axis=-1, keepdims=True), approx=True)

    # --- Attention-weighted values, all heads at once. ---
    o = jnp.einsum('hmn,hnd->hmd', p.astype(jnp.bfloat16), v_scr[...],
                   preferred_element_type=jnp.float32)                 # (H, tm, Dh)
    out = jnp.transpose(o, (1, 0, 2)).reshape(tm, D)                   # (tm, D)

    # --- Output projection + bias (f32 bias add). ---
    o_ref[0] = (jnp.dot(out.astype(jnp.bfloat16), wo_ref[...],
                        preferred_element_type=jnp.float32)
                + bo_ref[...]).astype(o_ref.dtype)


def attention(left, right, params, *, num_heads, d_head, mask=None, block_m=128):
    """left: (B, M, Dquery) f32, right: (B, N, Dcontext) f32,
    mask: (B, M, N) bool/int or None."""
    B, M, Dq = left.shape
    Bc, N, Dc = right.shape
    assert Bc == B
    D = num_heads * d_head
    wq, wk, wv, wo, bo = params         # bf16 weights (cast once at init), f32 bias

    # Query-axis tiling: full M when small ("block == full dim" satisfies the
    # (8,128) rule), otherwise 128-row tiles with zero padding (128 is also a
    # multiple of 32, so the int8 mask tiles pack cleanly).
    if M <= block_m:
        tm, m_pad = M, M
    else:
        tm = block_m
        m_pad = pl.cdiv(M, tm) * tm
    if m_pad != M:
        left = jnp.pad(left, ((0, 0), (0, m_pad - M), (0, 0)))
        if mask is not None:
            mask = jnp.pad(mask, ((0, 0), (0, m_pad - M), (0, 0)))

    has_mask = mask is not None
    kernel = functools.partial(_attention_kernel, num_heads=num_heads,
                               d_head=d_head, has_mask=has_mask)

    in_specs = [
        pl.BlockSpec((1, tm, Dq), lambda b, i: (b, i, 0)),      # left  (M-tiled)
        pl.BlockSpec((1, N, Dc), lambda b, i: (b, 0, 0)),       # right (per batch)
        pl.BlockSpec((Dq, D), lambda b, i: (0, 0)),             # Wq  (bf16, resident)
        pl.BlockSpec((Dc, D), lambda b, i: (0, 0)),             # Wk  (bf16, resident)
        pl.BlockSpec((Dc, D), lambda b, i: (0, 0)),             # Wv  (bf16, resident)
        pl.BlockSpec((D, Dq), lambda b, i: (0, 0)),             # Wout (bf16, resident)
        pl.BlockSpec((1, Dq), lambda b, i: (0, 0)),             # bout (f32)
    ]
    args = [left, right, wq, wk, wv, wo, bo]
    if has_mask:
        in_specs.append(pl.BlockSpec((1, tm, N), lambda b, i: (b, i, 0)))
        args.append(mask.astype(jnp.int8))   # 1-byte mask: 4x less DMA than f32

    grid_spec = pltpu.PrefetchScalarGridSpec(
        num_scalar_prefetch=0,
        grid=(B, m_pad // tm),
        in_specs=in_specs,
        out_specs=pl.BlockSpec((1, tm, Dq), lambda b, i: (b, i, 0)),
        scratch_shapes=[
            pltpu.VMEM((num_heads, N, d_head), jnp.bfloat16),   # K, head-major
            pltpu.VMEM((num_heads, N, d_head), jnp.bfloat16),   # V, head-major
        ],
    )

    out = pl.pallas_call(
        kernel,
        out_shape=jax.ShapeDtypeStruct((B, m_pad, Dq), jnp.float32),
        grid_spec=grid_spec,
        compiler_params=pltpu.CompilerParams(
            # batch axis parallel (megacore); M-tile axis stays in order so the
            # i==0 k/v projection runs before the other tiles of each batch.
            dimension_semantics=("parallel", "arbitrary"),
            # M-tiling keeps the per-step footprint small; 64 MiB is safe on
            # v7x; can be raised further on v5e/v6e (128 MiB physical VMEM).
            vmem_limit_bytes=64 * 1024 * 1024),
    )(*args)
    return out if m_pad == M else out[:, :M]


def init_params(key, Dquery, Dcontext, num_heads, d_head):
    """Deterministic synthetic parameters, stored (in, out) (PyTorch y = x @ W.T).
    Projection weights are cast to bf16 ONCE here (not per call)."""
    D = num_heads * d_head
    k1, k2, k3, k4, k5 = jax.random.split(key, 5)
    wq = (jax.random.normal(k1, (Dquery, D), jnp.float32) * 0.05).astype(jnp.bfloat16)
    wk = (jax.random.normal(k2, (Dcontext, D), jnp.float32) * 0.05).astype(jnp.bfloat16)
    wv = (jax.random.normal(k3, (Dcontext, D), jnp.float32) * 0.05).astype(jnp.bfloat16)
    wo = (jax.random.normal(k4, (D, Dquery), jnp.float32) * 0.05).astype(jnp.bfloat16)
    bo = jax.random.normal(k5, (1, Dquery), jnp.float32) * 0.05
    return wq, wk, wv, wo, bo


def attention_ref(left, right, params, *, num_heads, d_head, mask=None):
    """Pure-JAX f32 reference mirroring the PyTorch `Attention.compute`."""
    wq, wk, wv, wo, bo = params
    wq, wk, wv, wo = (w.astype(jnp.float32) for w in (wq, wk, wv, wo))
    B, M, _ = left.shape
    N = right.shape[1]
    D = num_heads * d_head
    q = left @ wq
    k = right @ wk
    v = right @ wv
    q = q.reshape(B, M, num_heads, d_head).transpose(0, 2, 1, 3)
    k = k.reshape(B, N, num_heads, d_head).transpose(0, 2, 1, 3)
    v = v.reshape(B, N, num_heads, d_head).transpose(0, 2, 1, 3)
    sim = (d_head ** -0.5) * jnp.einsum('bhmd,bhnd->bhmn', q, k)
    if mask is not None:
        sim = jnp.where(mask[:, None, :, :], sim, -10000000.0)
    attn = jax.nn.softmax(sim, axis=-1)
    out = jnp.einsum('bhmn,bhnd->bhmd', attn, v)
    out = out.transpose(0, 2, 1, 3).reshape(B, M, D)
    return out @ wo + bo[0]


if __name__ == "__main__":
    # Small shapes consistent with the module: query seq M, context seq N.
    B, M, N = 2, 16, 8
    Dquery, Dcontext = 32, 48
    num_heads, d_head = 2, 16

    key = jax.random.PRNGKey(0)
    k_l, k_r, k_p = jax.random.split(key, 3)
    left = jax.random.normal(k_l, (B, M, Dquery), jnp.float32)
    right = jax.random.normal(k_r, (B, N, Dcontext), jnp.float32)
    params = init_params(k_p, Dquery, Dcontext, num_heads, d_head)

    # Deterministic mask: each query row attends to a prefix of the context.
    mask = (jnp.arange(N)[None, None, :] <=
            (jnp.arange(M)[None, :, None] % N))
    mask = jnp.broadcast_to(mask, (B, M, N))

    tol = dict(atol=2e-2, rtol=2e-2)   # bf16 MXU operands + approx reciprocal

    # No-mask path.
    out = attention(left, right, params, num_heads=num_heads, d_head=d_head)
    out = jax.block_until_ready(out)
    ref = attention_ref(left, right, params, num_heads=num_heads, d_head=d_head)
    assert out.shape == (B, M, Dquery)
    assert jnp.allclose(out, ref, **tol), float(jnp.max(jnp.abs(out - ref)))

    # Masked path.
    out_m = attention(left, right, params, num_heads=num_heads, d_head=d_head,
                      mask=mask)
    out_m = jax.block_until_ready(out_m)
    ref_m = attention_ref(left, right, params, num_heads=num_heads,
                          d_head=d_head, mask=mask)
    assert jnp.allclose(out_m, ref_m, **tol), float(jnp.max(jnp.abs(out_m - ref_m)))

    print("KERNEL_OK")
</pallas_src>

<mosaic_0001>
module attributes {stable_mosaic.version = 11 : i64} {
  func.func @_attention_kernel(%arg0: i32, %arg1: i32, %arg2: memref<1x16x32xf32, #tpu.memory_space<vmem>>, %arg3: memref<1x8x48xf32, #tpu.memory_space<vmem>>, %arg4: memref<32x32xbf16, #tpu.memory_space<vmem>>, %arg5: memref<48x32xbf16, #tpu.memory_space<vmem>>, %arg6: memref<48x32xbf16, #tpu.memory_space<vmem>>, %arg7: memref<32x32xbf16, #tpu.memory_space<vmem>>, %arg8: memref<1x32xf32, #tpu.memory_space<vmem>>, %arg9: memref<1x16x32xf32, #tpu.memory_space<vmem>>, %arg10: memref<2x8x16xbf16, #tpu.memory_space<vmem>>, %arg11: memref<2x8x16xbf16, #tpu.memory_space<vmem>>) attributes {dimension_semantics = [#tpu.dimension_semantics<parallel>, #tpu.dimension_semantics<arbitrary>], iteration_bounds = array<i64: 2, 1>, scalar_prefetch = 0 : i64, scratch_operands = 2 : i64, tpu.core_type = #tpu.core_type<tc>, window_params = [{transform_indices = @transform_0, window_bounds = array<i64: 1, 16, 32>}, {transform_indices = @transform_1, window_bounds = array<i64: 1, 8, 48>}, {pipeline_mode = #tpu.pipeline_mode<synchronous>, transform_indices = @transform_2, window_bounds = array<i64: 32, 32>}, {pipeline_mode = #tpu.pipeline_mode<synchronous>, transform_indices = @transform_3, window_bounds = array<i64: 48, 32>}, {pipeline_mode = #tpu.pipeline_mode<synchronous>, transform_indices = @transform_4, window_bounds = array<i64: 48, 32>}, {pipeline_mode = #tpu.pipeline_mode<synchronous>, transform_indices = @transform_5, window_bounds = array<i64: 32, 32>}, {pipeline_mode = #tpu.pipeline_mode<synchronous>, transform_indices = @transform_6, window_bounds = array<i64: 1, 32>}, {transform_indices = @transform_7, window_bounds = array<i64: 1, 16, 32>}]} {
    %c0_i32 = arith.constant 0 : i32
    %0 = arith.cmpi eq, %arg1, %c0_i32 : i32
    %1 = arith.extui %0 : i1 to i32
    %c0_i32_0 = arith.constant 0 : i32
    %2 = arith.cmpi ne, %1, %c0_i32_0 : i32
    scf.if %2 {
      %c0_24 = arith.constant 0 : index
      %c0_25 = arith.constant 0 : index
      %c0_26 = arith.constant 0 : index
      %39 = vector.load %arg3[%c0_24, %c0_25, %c0_26] : memref<1x8x48xf32, #tpu.memory_space<vmem>>, vector<1x8x48xf32>
      %40 = vector.shape_cast %39 : vector<1x8x48xf32> to vector<8x48xf32>
      %41 = arith.truncf %40 : vector<8x48xf32> to vector<8x48xbf16>
      %c0_27 = arith.constant 0 : index
      %c0_28 = arith.constant 0 : index
      %42 = vector.load %arg5[%c0_27, %c0_28] : memref<48x32xbf16, #tpu.memory_space<vmem>>, vector<48x32xbf16>
      %cst_29 = arith.constant dense<0.000000e+00> : vector<8x32xf32>
      %43 = tpu.matmul %41, %42, %cst_29 {dimension_numbers = #tpu.dot_dimension_numbers<[1], [0], [0], [1], [0, 0, 1, 1], [], []>} : vector<8x48xbf16>, vector<48x32xbf16>, vector<8x32xf32> -> vector<8x32xf32>
      %c0_30 = arith.constant 0 : index
      %c0_31 = arith.constant 0 : index
      %44 = vector.load %arg6[%c0_30, %c0_31] : memref<48x32xbf16, #tpu.memory_space<vmem>>, vector<48x32xbf16>
      %cst_32 = arith.constant dense<0.000000e+00> : vector<8x32xf32>
      %45 = tpu.matmul %41, %44, %cst_32 {dimension_numbers = #tpu.dot_dimension_numbers<[1], [0], [0], [1], [0, 0, 1, 1], [], []>} : vector<8x48xbf16>, vector<48x32xbf16>, vector<8x32xf32> -> vector<8x32xf32>
      %46 = vector.shape_cast %43 : vector<8x32xf32> to vector<8x2x16xf32>
      %47 = tpu.transpose %46, [1, 0, 2] : vector<8x2x16xf32> -> vector<2x8x16xf32>
      %48 = arith.truncf %47 : vector<2x8x16xf32> to vector<2x8x16xbf16>
      %c0_33 = arith.constant 0 : index
      %c0_34 = arith.constant 0 : index
      %c0_35 = arith.constant 0 : index
      %49 = vector.load %arg10[%c0_33, %c0_34, %c0_35] : memref<2x8x16xbf16, #tpu.memory_space<vmem>>, vector<2x8x16xbf16>
      tpu.vector_store %arg10[%c0_33, %c0_34, %c0_35], %48 {strides = array<i32>} : memref<2x8x16xbf16, #tpu.memory_space<vmem>>, vector<2x8x16xbf16>,
      %50 = vector.shape_cast %45 : vector<8x32xf32> to vector<8x2x16xf32>
      %51 = tpu.transpose %50, [1, 0, 2] : vector<8x2x16xf32> -> vector<2x8x16xf32>
      %52 = arith.truncf %51 : vector<2x8x16xf32> to vector<2x8x16xbf16>
      %c0_36 = arith.constant 0 : index
      %c0_37 = arith.constant 0 : index
      %c0_38 = arith.constant 0 : index
      %53 = vector.load %arg11[%c0_36, %c0_37, %c0_38] : memref<2x8x16xbf16, #tpu.memory_space<vmem>>, vector<2x8x16xbf16>
      tpu.vector_store %arg11[%c0_36, %c0_37, %c0_38], %52 {strides = array<i32>} : memref<2x8x16xbf16, #tpu.memory_space<vmem>>, vector<2x8x16xbf16>,
    } else {
    }
    %c0 = arith.constant 0 : index
    %c0_1 = arith.constant 0 : index
    %c0_2 = arith.constant 0 : index
    %3 = vector.load %arg2[%c0, %c0_1, %c0_2] : memref<1x16x32xf32, #tpu.memory_space<vmem>>, vector<1x16x32xf32>
    %4 = vector.shape_cast %3 : vector<1x16x32xf32> to vector<16x32xf32>
    %5 = arith.truncf %4 : vector<16x32xf32> to vector<16x32xbf16>
    %c0_3 = arith.constant 0 : index
    %c0_4 = arith.constant 0 : index
    %6 = vector.load %arg4[%c0_3, %c0_4] : memref<32x32xbf16, #tpu.memory_space<vmem>>, vector<32x32xbf16>
    %cst = arith.constant dense<0.000000e+00> : vector<16x32xf32>
    %7 = tpu.matmul %5, %6, %cst {dimension_numbers = #tpu.dot_dimension_numbers<[1], [0], [0], [1], [0, 0, 1, 1], [], []>} : vector<16x32xbf16>, vector<32x32xbf16>, vector<16x32xf32> -> vector<16x32xf32>
    %8 = vector.shape_cast %7 : vector<16x32xf32> to vector<16x2x16xf32>
    %9 = tpu.transpose %8, [1, 0, 2] : vector<16x2x16xf32> -> vector<2x16x16xf32>
    %10 = arith.truncf %9 : vector<2x16x16xf32> to vector<2x16x16xbf16>
    %c0_5 = arith.constant 0 : index
    %c0_6 = arith.constant 0 : index
    %c0_7 = arith.constant 0 : index
    %11 = vector.load %arg10[%c0_5, %c0_6, %c0_7] : memref<2x8x16xbf16, #tpu.memory_space<vmem>>, vector<2x8x16xbf16>
    "tpu.trace_start"() <{level = 10 : i32, message = "hmd,hnd->hmn"}> : () -> ()
    %cst_8 = arith.constant dense<0.000000e+00> : vector<2x16x8xf32>
    %12 = tpu.matmul %10, %11, %cst_8 {dimension_numbers = #tpu.dot_dimension_numbers<[2], [2], [1], [1], [0, 0, 0, 1, 1, 1], [0], [0]>} : vector<2x16x16xbf16>, vector<2x8x16xbf16>, vector<2x16x8xf32> -> vector<2x16x8xf32>
    "tpu.trace_stop"() : () -> ()
    %cst_9 = arith.constant 2.500000e-01 : f32
    %13 = vector.broadcast %cst_9 : f32 to vector<2x16x8xf32>
    %14 = arith.mulf %12, %13 : vector<2x16x8xf32>
    %cst_10 = arith.constant dense<0xFF800000> : vector<2x16xf32>
    %15 = vector.multi_reduction <maximumf>, %14, %cst_10 [2] : vector<2x16x8xf32> to vector<2x16xf32>
    %16 = vector.shape_cast %15 : vector<2x16xf32> to vector<2x16x1xf32>
    %17 = vector.broadcast %16 : vector<2x16x1xf32> to vector<2x16x8xf32>
    %18 = arith.subf %14, %17 : vector<2x16x8xf32>
    %19 = math.exp %18 : vector<2x16x8xf32>
    %cst_11 = arith.constant dense<0.000000e+00> : vector<2x16xf32>
    %20 = vector.multi_reduction <add>, %19, %cst_11 [2] : vector<2x16x8xf32> to vector<2x16xf32>
    %21 = vector.shape_cast %20 : vector<2x16xf32> to vector<2x16x1xf32>
    %22 = tpu.reciprocal %21 {approx = true} : vector<2x16x1xf32> -> vector<2x16x1xf32>
    %23 = vector.broadcast %22 : vector<2x16x1xf32> to vector<2x16x8xf32>
    %24 = arith.mulf %19, %23 : vector<2x16x8xf32>
    %25 = arith.truncf %24 : vector<2x16x8xf32> to vector<2x16x8xbf16>
    %c0_12 = arith.constant 0 : index
    %c0_13 = arith.constant 0 : index
    %c0_14 = arith.constant 0 : index
    %26 = vector.load %arg11[%c0_12, %c0_13, %c0_14] : memref<2x8x16xbf16, #tpu.memory_space<vmem>>, vector<2x8x16xbf16>
    "tpu.trace_start"() <{level = 10 : i32, message = "hmn,hnd->hmd"}> : () -> ()
    %cst_15 = arith.constant dense<0.000000e+00> : vector<2x16x16xf32>
    %27 = tpu.matmul %25, %26, %cst_15 {dimension_numbers = #tpu.dot_dimension_numbers<[2], [1], [1], [2], [0, 0, 0, 1, 1, 2], [0], [0]>} : vector<2x16x8xbf16>, vector<2x8x16xbf16>, vector<2x16x16xf32> -> vector<2x16x16xf32>
    "tpu.trace_stop"() : () -> ()
    %28 = tpu.transpose %27, [1, 0, 2] : vector<2x16x16xf32> -> vector<16x2x16xf32>
    %29 = vector.shape_cast %28 : vector<16x2x16xf32> to vector<16x32xf32>
    %30 = arith.truncf %29 : vector<16x32xf32> to vector<16x32xbf16>
    %c0_16 = arith.constant 0 : index
    %c0_17 = arith.constant 0 : index
    %31 = vector.load %arg7[%c0_16, %c0_17] : memref<32x32xbf16, #tpu.memory_space<vmem>>, vector<32x32xbf16>
    %cst_18 = arith.constant dense<0.000000e+00> : vector<16x32xf32>
    %32 = tpu.matmul %30, %31, %cst_18 {dimension_numbers = #tpu.dot_dimension_numbers<[1], [0], [0], [1], [0, 0, 1, 1], [], []>} : vector<16x32xbf16>, vector<32x32xbf16>, vector<16x32xf32> -> vector<16x32xf32>
    %c0_19 = arith.constant 0 : index
    %c0_20 = arith.constant 0 : index
    %33 = vector.load %arg8[%c0_19, %c0_20] : memref<1x32xf32, #tpu.memory_space<vmem>>, vector<1x32xf32>
    %34 = vector.broadcast %33 : vector<1x32xf32> to vector<16x32xf32>
    %35 = arith.addf %32, %34 : vector<16x32xf32>
    %c0_21 = arith.constant 0 : index
    %c0_22 = arith.constant 0 : index
    %c0_23 = arith.constant 0 : index
    %36 = vector.load %arg9[%c0_21, %c0_22, %c0_23] : memref<1x16x32xf32, #tpu.memory_space<vmem>>, vector<1x16x32xf32>
    %37 = vector.shape_cast %36 : vector<1x16x32xf32> to vector<16x32xf32>
    %38 = vector.shape_cast %35 : vector<16x32xf32> to vector<1x16x32xf32>
    tpu.vector_store %arg9[%c0_21, %c0_22, %c0_23], %38 {strides = array<i32>} : memref<1x16x32xf32, #tpu.memory_space<vmem>>, vector<1x16x32xf32>,
    return
  }
  func.func @transform_0(%arg0: i32, %arg1: i32) -> (i32, i32, i32) {
    %c0_i32 = arith.constant 0 : i32
    %c0_i32_0 = arith.constant 0 : i32
    return %arg0, %arg1, %c0_i32 : i32, i32, i32
  }
  func.func @transform_1(%arg0: i32, %arg1: i32) -> (i32, i32, i32) {
    %c0_i32 = arith.constant 0 : i32
    %c0_i32_0 = arith.constant 0 : i32
    %c0_i32_1 = arith.constant 0 : i32
    return %arg0, %c0_i32, %c0_i32_0 : i32, i32, i32
  }
  func.func @transform_2(%arg0: i32, %arg1: i32) -> (i32, i32) {
    %c0_i32 = arith.constant 0 : i32
    %c0_i32_0 = arith.constant 0 : i32
    %c0_i32_1 = arith.constant 0 : i32
    return %c0_i32, %c0_i32_0 : i32, i32
  }
  func.func @transform_3(%arg0: i32, %arg1: i32) -> (i32, i32) {
    %c0_i32 = arith.constant 0 : i32
    %c0_i32_0 = arith.constant 0 : i32
    %c0_i32_1 = arith.constant 0 : i32
    return %c0_i32, %c0_i32_0 : i32, i32
  }
  func.func @transform_4(%arg0: i32, %arg1: i32) -> (i32, i32) {
    %c0_i32 = arith.constant 0 : i32
    %c0_i32_0 = arith.constant 0 : i32
    %c0_i32_1 = arith.constant 0 : i32
    return %c0_i32, %c0_i32_0 : i32, i32
  }
  func.func @transform_5(%arg0: i32, %arg1: i32) -> (i32, i32) {
    %c0_i32 = arith.constant 0 : i32
    %c0_i32_0 = arith.constant 0 : i32
    %c0_i32_1 = arith.constant 0 : i32
    return %c0_i32, %c0_i32_0 : i32, i32
  }
  func.func @transform_6(%arg0: i32, %arg1: i32) -> (i32, i32) {
    %c0_i32 = arith.constant 0 : i32
    %c0_i32_0 = arith.constant 0 : i32
    %c0_i32_1 = arith.constant 0 : i32
    return %c0_i32, %c0_i32_0 : i32, i32
  }
  func.func @transform_7(%arg0: i32, %arg1: i32) -> (i32, i32, i32) {
    %c0_i32 = arith.constant 0 : i32
    %c0_i32_0 = arith.constant 0 : i32
    return %arg0, %arg1, %c0_i32 : i32, i32, i32
  }
}

</mosaic_0001>

<bundles_post_ra>
// kernel: tpu_custom_call.1
= control target key start
LH: loop header
LB: loop body
LE: loop exit
PB: predicated region body
PF: predicated region fallthrough
CT: control target
= control target key end

     0   :  { %s2086_s0 = inlined_call_operand.vmem [shape: f32[2,16,32], index: 0, kind: input, shape index: {}]   ;;  %s2087_s1 = inlined_call_operand.vmem [shape: f32[2,8,48], index: 1, kind: input, shape index: {}]   ;;  %s2088_s2 = inlined_call_operand.vmem [shape: bf16[32,32], index: 2, kind: input, shape index: {}]   ;;  %s2089_s3 = inlined_call_operand.vmem [shape: bf16[48,32], index: 3, kind: input, shape index: {}]   ;;  %s2090_s4 = inlined_call_operand.vmem [shape: bf16[48,32], index: 4, kind: input, shape index: {}]   ;;  %s2091_s5 = inlined_call_operand.hbm [shape: bf16[32,32], index: 5, kind: input, shape index: {}]   ;;  %s2092_s6 = inlined_call_operand.vmem [shape: f32[1,32], index: 6, kind: input, shape index: {}]   ;;  %s2093_s7 = inlined_call_operand.hbm [shape: f32[2,16,32], index: 7, kind: output, shape index: {}]  }
   0x1   :  { %2094 = sst [smem:[#allocation10_spill]] %s2091_s5 }
   0x2   :  { %12 = vsyncpa [#allocation5], 0 }
   0x3   :  { %13 = vsyncpa [#allocation6], 0 }
   0x4   :  { %15 = vsyncpa [#allocation6 + $0x1], 0  ;;  %s1705_s24 = smov 0   ;;  %s1707_s25 = smov 0  }
   0x5   :  { %s1709_s26 = smov 0   ;;  %s1711_s27 = smov 0  }
   0x6   :  { %s1713_s28 = smov 0   ;;  %s1715_s29 = smov 0  }
   0x7 LB: > { %s1365_s30 = sadd.s32 4294967295, %s1654_s29   ;;  %s1366_s8 = sadd.s32 4294967294, %s1654_s29   ;;  %s1654_s29 = sphi %s1715_s29, %s21_s29   ;;  %s1650_s28 = sphi %s1713_s28, %s2102_s28   ;;  %s1646_s27 = sphi %s1711_s27, %s2101_s27   ;;  %s1642_s26 = sphi %s1709_s26, %s2100_s26   ;;  %s1638_s25 = sphi %s1707_s25, %s2099_s25   ;;  %s1634_s24 = sphi %s1705_s24, %s2098_s24  }
   0x8   : > { %s33_s9 = sadd.s32 1, %s1650_s28  ;;  %s201_s10 = sadd.s32 1, %s1642_s26 }
   0x9   : > { %p35_p0 = scmp.ge.s32.totalorder %s33_s9, 2  ;;  %p211_p1 = scmp.ne.s32.totalorder %s1642_s26, %s1638_s25 }
   0xa   : > { %p212_p2 = scmp.eq.s32.totalorder %s1365_s30, 1  ;;  %p217_p3 = scmp.ne.s32.totalorder %s1638_s25, %s1634_s24 }
   0xb   : > { %s2104_s9 = smov (%p35_p0, %s33_s9), 0  ;;  %p218_p5 = scmp.eq.s32.totalorder %s1366_s8, 1 }
   0xc   : > { %p1745_p4 = por %p212_p2, %p211_p1  ;;  %s196_s12 = ssub.s32 %s1650_s28, %s2104_s9 }
   0xd   : > { %p1367_p6 = scmp.ge.s32.totalorder %s1654_s29, 1  ;;  %p199_p7 = scmp.eq.s32.totalorder %s196_s12, 0 }
   0xe   : > { %p1752_p8 = por %p218_p5, %p217_p3  ;;  %p225_p9 = scmp.lt.s32.totalorder %s1654_s29, 3 }
   0xf   : > { %s1758_s14 = scalar_select %p199_p7, %s1642_s26, %s201_s10  }
  0x10   : > { %p226_p10 = pnand %p1367_p6, %p225_p9  ;;  %p1455_p11 = scmp.eq.s32.totalorder %s1365_s30, 0 }
  0x11   : > { %s2097_s5 = sld [smem:[#allocation10_spill]]  ;;  %s1656_s18 = smov [#allocation4]  }
  0x12   : > { %p1447_p12 = pneg %p226_p10  ;;  %s247_s19 = sshll.u32 %s1656_s18, 4  ;;  %s248_s19 = int_to_ptr.vmem [resolvable:$true] %s247_s19 }
  0x13   : > { %s1657_s20 = smov 64   ;;  %s1658_s21 = smov 4  }
  0x14   : > { %p1448_p13 = pnand %p1455_p11, %p1447_p12  ;;  %286 = sbr.rel (%p226_p10) target bundleno = 1136 (0x470), region = 48 }
  0x17   : > { %s245_s17 = sshll.u32 %s2097_s5, 4  ;;  %s246_s17 = int_to_ptr.hbm [resolvable:$true] %s245_s17 }
  0x18   : > { %1450 = dma.hbm_to_vmem [thread:$0]  (!%p1448_p13), %s246_s17, 256, %s248_s19, [#allocation5], %s1657_s20, %s1657_s20, %s1658_s21  }
  0x19   : > { %1625 = dma.done.wait (%p1455_p11), [#allocation5], 256  }
  0x1a   : > { %1627 = vsyncadd (%p1455_p11), [#allocation5], 4294967040  ;;  %p328_p0 = scmp.lt.s32.totalorder %s1646_s27, 1  ;;  %v1432_v0 = vld [vmem:[%s2089_s3 + $0x10] sm:$0xff]  ;;  %v1437_v1 = vld [vmem:[%s2088_s2 + $0x8] sm:$0xff]  ;;  %vm644_vm0 = vcmask 261120  }
  0x1b   : > { %v1431_v2 = vld [vmem:[%s2089_s3 + $0x8] sm:$0xff]  ;;  %v1436_v3 = vld [vmem:[%s2088_s2] sm:$0xff]  ;;  %382 = vmatpush.bf16.msra.mxu0 %v1432_v0  ;;  %654 = vmatpush.bf16.msra.mxu2 %v1437_v1  ;;  %vm373_vm1 = vcmask 392192   ;;  %s1659_s5 = smov 112   ;;  %v1660_v15 = vmov 1983009808  }
  0x1c   : > { %s329_s22 = scalar_select %p328_p0, %s1646_s27, 1  ;;  %v1430_v7 = vld [vmem:[%s2089_s3] sm:$0xff]  ;;  %v435_v16 = vunpack.c.l.s4 %v1660_v15  ;;  %vm432_vm2 = vcmask 1047556   ;;  %v1435_v19 = vld [vmem:[%s2090_s4 + $0x10] sm:$0xff]  ;;  %v1661_v20 = vmov 1934713408  }
  0x1d   : > { %v457_v21 = vunpack.c.l.s4 %v1661_v20  ;;  %419 = vmatpush.bf16.msra.mxu1 %v1435_v19  ;;  %v1434_v24 = vld [vmem:[%s2090_s4 + $0x8] sm:$0xff]  ;;  %v1433_v31 = vld [vmem:[%s2090_s4] sm:$0xff]  ;;  %vm524_vm3 = vcmask 125952   ;;  %vm862_vm4 = vcmask 130048   ;;  %vm912_vm5 = vcmask 64512   ;;  %s1662_s20 = smov 16  }
  0x1e   : > { %s1429_s23 = sshll.u32 %s329_s22, 4  ;;  %s1375_s17 = sshll.u32 %s329_s22, 3  ;;  %v1790_v18 = vunpack.c.0.s8 %v435_v16  ;;  %vm971_vm6 = vcmask 1043456  }
  0x1f   : > { %s335_s10 = scalar_lea.vmem %s2086_s0, %s1429_s23  ;;  %s340_s8 = scalar_lea.vmem %s2087_s1, %s1375_s17  ;;  %383 = vmatpush.bf16.msra.mxu0 %v1431_v2  ;;  %655 = vmatpush.bf16.msra.mxu2 %v1436_v3  ;;  %v1801_v26 = vunpack.c.0.s8 %v457_v21 }
  0x20   : > { %v625_v4 = vld [vmem:[%s335_s10] sm:$0xff]  ;;  %v626_v5 = vld [vmem:[%s335_s10 + $0x8] sm:$0xff]  ;;  %s324_s21 = sand.u32 1, %s1638_s25   ;;  %s1440_s22 = sshll.u32 %s1646_s27, 4 }
  0x21   : > { %v627_v6 = vpack.c.bf16 %v626_v5, %v625_v4  ;;  %v347_v8 = vld [vmem:[%s340_s8] sm:$0xff]  ;;  %420 = vmatpush.bf16.msra.mxu1 %v1434_v24  ;;  %s1372_s23 = sshll.u32 %s324_s21, 4  ;;  %s1258_s15 = scalar_lea.hbm %s2093_s7, %s1440_s22 }
  0x22   : > { %v348_v9 = vpack.c.bf16 %v347_v8, %v347_v8  ;;  %s326_s12 = scalar_lea.vmem [#allocation7], %s1372_s23  ;;  %s1261_s18 = sshll.u32 %s1258_s15, 4  ;;  %s1262_s18 = int_to_ptr.hbm [resolvable:$true] %s1261_s18 }
  0x23   : > { %1410 = vmatmul.msk.bf16.vlgmr.msra.gmra.mxu2 %vm644_vm0, %v627_v6  ;;  %384 = vmatpush.bf16.msra.mxu0 %v1430_v7  ;;  %s1259_s16 = sshll.u32 %s326_s12, 4  ;;  %s1245_s17 = scalar_lea.sflag [#allocation6], %s324_s21  ;;  %s1260_s16 = int_to_ptr.vmem [resolvable:$true] %s1259_s16 }
  0x24   : > { %s1586_s19 = sshra.s32 %s1262_s18, 4  ;;  %s1592_s30 = scalar_lea.hbm %s2093_s7, 32  ;;  %s1587_s19 = int_to_ptr.hbm [resolvable:$true] %s1586_s19 }
  0x25   : > { %421 = vmatpush.bf16.msra.mxu1 %v1433_v31  ;;  %s1588_s27 = scalar_lea.hbm %s1587_s19, 16  ;;  %p1593_p5 = scmp.lt.s32.totalorder %s1587_s19, %s2093_s7 }
  0x26   : > { %1388 = vmatmul.msk.bf16.vlgmr.msra.gmra.mxu0 %vm373_vm1, %v348_v9  ;;  %p1589_p1 = scmp.ne.s32.totalorder %s1587_s19, %s1588_s27  ;;  %p1594_p6 = scmp.lt.s32.totalorder %s1592_s30, %s1588_s27 }
  0x28   : > { %1401 = vmatmul.msk.bf16.vlgmr.msra.gmra.mxu1 %vm373_vm1, %v348_v9  ;;  %p1590_p2 = pnand %p1589_p1, %p1745_p4  ;;  %p1595_p7 = por %p1594_p6, %p1593_p5 }
  0x2a   : > { %p1591_p3 = pneg %p1590_p2 }
  0x2c   : > { %p1596_p9 = pnand %p1595_p7, %p1591_p3 }
  0xa3   : > { %v386_v10 = vpop.f32.mrf.mxu0 }
  0xa4   : > { %428 = vrot.lane.b32.xlu0 %v386_v10, %s1659_s5  ;;  %v431_v17 = vrot.slane %v386_v10, 4  ;;  %v437_v23 = vperm.slane %v386_v10, %v1790_v18 }
  0xa6   : > { %v657_v11 = vpop.f32.mrf.mxu2  ;;  %v433_v22 = vsel %vm432_vm2, 0.0, %v431_v17  ;;  %v454_v28 = vrot.slane %v437_v23, 4 }
  0xa7   : > { %v441_v25 = vperm.slane %v433_v22, %v1790_v18  ;;  %v670_v36 = vrot.slane %v657_v11, 4  ;;  %v1812_v39 = vperm.slane %v657_v11, %v1790_v18 }
  0xa9   : > { %v466_v35 = vrot.slane %v441_v25, 4  ;;  %v672_v47 = vsel %vm432_vm2, 0.0, %v670_v36  ;;  %v693_v55 = vrot.slane %v1812_v39, 4 }
  0xaa   : > { %v1831_v62 = vperm.slane %v672_v47, %v1790_v18 }
  0xab   : > { %v388_v12 = vpop.f32.mrf.mxu0 }
  0xae   : > { %v659_v13 = vpop.f32.mrf.mxu2 }
  0xaf   : > { %v1515_v14 = vpack.i.bf16 %v659_v13, %v657_v11  ;;  %v723_v40 = vrot.slane %v659_v13, 4  ;;  %v728_v56 = vperm.slane %v659_v13, %v1790_v18 }
  0xb1   : > { %1516 = vrot.lane.b32.xlu0 %v1515_v14, %s1659_s5  ;;  %v724_v51 = vsel %vm432_vm2, 0.0, %v723_v40  ;;  %v745_v7 = vrot.slane %v728_v56, 4 }
  0xb2   : > { %v732_v63 = vperm.slane %v724_v51, %v1790_v18 }
  0xb4   : > { %v757_v15 = vrot.slane %v732_v63, 4 }
 0x116   : > { %v429_v27 = vpop.permute.xlu0 %428 }
 0x117   : > { %v442_v29 = vrot.slane %v429_v27, 4  ;;  %v447_v30 = vperm.slane %v429_v27, %v1790_v18 }
 0x119   : > { %v443_v32 = vsel %vm432_vm2, 0.0, %v442_v29  ;;  %v452_v33 = vrot.slane %v447_v30, 4  ;;  %v455_v34 = vsel %vm432_vm2, %v447_v30, %v454_v28 }
 0x11a   : > { %v451_v37 = vperm.slane %v443_v32, %v1790_v18  ;;  %v463_v38 = vperm.slane %v455_v34, %v1801_v26 }
 0x11b   : > { %v453_v41 = vsel %vm432_vm2, %v452_v33, %v437_v23 }
 0x11c   : > { %v459_v42 = vperm.slane %v453_v41, %v1801_v26  ;;  %v464_v43 = vrot.slane %v451_v37, 4  ;;  %v467_v44 = vsel %vm432_vm2, %v451_v37, %v466_v35  ;;  %v478_v45 = vrot.slane %v463_v38, 4 }
 0x11d   : > { %v475_v46 = vperm.slane %v467_v44, %v1801_v26 }
 0x11e   : > { %v465_v48 = vsel %vm432_vm2, %v464_v43, %v441_v25  ;;  %v476_v49 = vrot.slane %v459_v42, 4  ;;  %v479_v50 = vsel %vm432_vm2, 0.0, %v478_v45  ;;  %v484_v60 = vsel %vm432_vm2, %v478_v45, %v459_v42 }
 0x11f   : > { %v471_v52 = vperm.slane %v465_v48, %v1801_v26  ;;  %v482_v53 = vrot.slane %v475_v46, 4  ;;  %v489_v54 = vrot.slane %v479_v50, 4  ;;  %v488_v8 = vperm.slane %v484_v60, %v1790_v18 }
 0x120   : > { %v477_v57 = vsel %vm432_vm2, 0.0, %v476_v49 }
 0x121   : > { %v480_v58 = vrot.slane %v471_v52, 4  ;;  %v483_v59 = vsel %vm432_vm2, 0.0, %v482_v53  ;;  %v490_v61 = vsel %vm432_vm2, %v489_v54, %v477_v57  ;;  %v495_v4 = vsel %vm432_vm2, %v482_v53, %v471_v52 }
 0x122   : > { %v494_v0 = vperm.slane %v490_v61, %v1790_v18  ;;  %v500_v1 = vrot.slane %v483_v59, 4  ;;  %v499_v16 = vperm.slane %v495_v4, %v1790_v18  ;;  %v705_v54 = vrot.slane %v1831_v62, 4 }
 0x123   : > { %v1517_v2 = vpop.permute.xlu0 %1516  ;;  %v481_v3 = vsel %vm432_vm2, 0.0, %v480_v58 }
 0x124   : > { %v1519_v5 = vunpack.i.h.bf16 %v1517_v2  ;;  %v1518_v6 = vunpack.i.l.bf16 %v1517_v2  ;;  %v501_v9 = vsel %vm432_vm2, %v500_v1, %v481_v3  ;;  %v506_v10 = vrot.slane %v494_v0, 4 }
 0x125   : > { %v505_v11 = vperm.slane %v501_v9, %v1790_v18 }
 0x126   : > { %v733_v12 = vrot.slane %v1519_v5, 4  ;;  %v738_v13 = vperm.slane %v1519_v5, %v1790_v18  ;;  %v681_v14 = vrot.slane %v1518_v6, 4  ;;  %v507_v17 = vsel %vm432_vm2, %v506_v10, %v488_v8 }
 0x127   : > { %v686_v19 = vperm.slane %v1518_v6, %v1790_v18  ;;  %v511_v20 = vperm.slane %v507_v17, %v1801_v26  ;;  %v512_v21 = vrot.slane %v505_v11, 4 }
 0x128   : > { %v734_v22 = vsel %vm432_vm2, 0.0, %v733_v12  ;;  %v743_v23 = vrot.slane %v738_v13, 4  ;;  %v746_v25 = vsel %vm432_vm2, %v738_v13, %v745_v7  ;;  %v682_v27 = vsel %vm432_vm2, 0.0, %v681_v14 }
 0x129   : > { %v742_v24 = vperm.slane %v734_v22, %v1790_v18  ;;  %v691_v28 = vrot.slane %v686_v19, 4  ;;  %v513_v29 = vsel %vm432_vm2, %v512_v21, %v499_v16  ;;  %v520_v30 = vrot.slane %v511_v20, 4 }
 0x12a   : > { %v744_v31 = vsel %vm432_vm2, %v743_v23, %v728_v56  ;;  %v754_v32 = vperm.slane %v746_v25, %v1801_v26  ;;  %v517_v33 = vperm.slane %v513_v29, %v1801_v26  ;;  %v690_v40 = vperm.slane %v682_v27, %v1790_v18 }
 0x12b   : > { %v750_v34 = vperm.slane %v744_v31, %v1801_v26  ;;  %v755_v35 = vrot.slane %v742_v24, 4  ;;  %v758_v36 = vsel %vm432_vm2, %v742_v24, %v757_v15  ;;  %v692_v41 = vsel %vm432_vm2, %v691_v28, %v1812_v39 }
 0x12c   : > { %v766_v37 = vperm.slane %v758_v36, %v1801_v26  ;;  %v769_v38 = vrot.slane %v754_v32, 4  ;;  %v518_v42 = vrot.slane %v517_v33, 4  ;;  %v521_v43 = vsel %vm432_vm2, %v517_v33, %v520_v30 }
 0x12d   : > { %v756_v44 = vsel %vm432_vm2, %v755_v35, %v732_v63  ;;  %v767_v45 = vrot.slane %v750_v34, 4  ;;  %v523_v46 = vpack.c.bf16 %v521_v43, %v521_v43  ;;  %v694_v63 = vsel %vm432_vm2, %v686_v19, %v693_v55 }
 0x12e   : > { %v762_v47 = vperm.slane %v756_v44, %v1801_v26  ;;  %v770_v48 = vsel %vm432_vm2, 0.0, %v769_v38  ;;  %v773_v49 = vrot.slane %v766_v37, 4  ;;  %v519_v50 = vsel %vm432_vm2, %v518_v42, %v511_v20 }
 0x12f   : > { %v768_v51 = vsel %vm432_vm2, 0.0, %v767_v45  ;;  %v813_v52 = vsel %vm432_vm2, %v769_v38, %v750_v34  ;;  %v818_v53 = vrot.slane %v770_v48, 4  ;;  %v522_v56 = vpack.c.bf16 %v519_v50, %v519_v50  ;;  %526 = vst.msk [vmem:[#allocation2 + $0x4] sm:$0xf] %vm524_vm3, %v523_v46 }
 0x130   : > { %v771_v57 = vrot.slane %v762_v47, 4  ;;  %v774_v58 = vsel %vm432_vm2, 0.0, %v773_v49  ;;  %v817_v59 = vperm.slane %v813_v52, %v1790_v18  ;;  %v824_v2 = vsel %vm432_vm2, %v773_v49, %v762_v47 }
 0x131   : > { %v819_v60 = vsel %vm432_vm2, %v818_v53, %v768_v51  ;;  %v829_v61 = vrot.slane %v774_v58, 4  ;;  %525 = vst.msk [vmem:[#allocation2] sm:$0xf] %vm524_vm3, %v522_v56  ;;  %v698_v3 = vperm.slane %v692_v41, %v1801_v26  ;;  %v702_v5 = vperm.slane %v694_v63, %v1801_v26 }
 0x132   : > { %v772_v0 = vsel %vm432_vm2, 0.0, %v771_v57  ;;  %v823_v1 = vperm.slane %v819_v60, %v1790_v18  ;;  %v703_v6 = vrot.slane %v690_v40, 4  ;;  %v706_v7 = vsel %vm432_vm2, %v690_v40, %v705_v54 }
 0x133   : > { %v830_v4 = vsel %vm432_vm2, %v829_v61, %v772_v0  ;;  %v714_v8 = vperm.slane %v706_v7, %v1801_v26  ;;  %v715_v9 = vrot.slane %v698_v3, 4  ;;  %v717_v11 = vrot.slane %v702_v5, 4 }
 0x134   : > { %v834_v39 = vperm.slane %v830_v4, %v1790_v18  ;;  %v835_v55 = vrot.slane %v823_v1, 4  ;;  %v704_v10 = vsel %vm432_vm2, %v703_v6, %v1831_v62  ;;  %v828_v12 = vperm.slane %v824_v2, %v1790_v18 }
 0x135   : > { %v710_v13 = vperm.slane %v704_v10, %v1801_v26  ;;  %v721_v14 = vrot.slane %v714_v8, 4  ;;  %v716_v16 = vsel %vm432_vm2, 0.0, %v715_v9  ;;  %v718_v17 = vsel %vm432_vm2, 0.0, %v717_v11 }
 0x136   : > { %v836_v15 = vsel %vm432_vm2, %v835_v55, %v817_v59  ;;  %v856_v19 = vld [vmem:[#allocation2 + $0x4] sm:$0xf]  ;;  %v841_v21 = vrot.slane %v834_v39, 4  ;;  %v780_v23 = vrot.slane %v718_v17, 4  ;;  %v775_v24 = vsel %vm432_vm2, %v717_v11, %v698_v3  ;;  %v423_v3 = vpop.f32.mrf.mxu1 }
 0x137   : > { %v840_v20 = vperm.slane %v836_v15, %v1801_v26  ;;  %v719_v22 = vrot.slane %v710_v13, 4  ;;  %v722_v62 = vsel %vm432_vm2, 0.0, %v721_v14  ;;  %v892_v27 = vsel %vm862_vm4, %v856_v19, 0  ;;  %528 = vrot.lane.b32.xlu0 %v423_v3, %s1659_s5 }
 0x138   : > { %v791_v25 = vrot.slane %v722_v62, 4  ;;  %v855_v28 = vld [vmem:[#allocation2] sm:$0xf]  ;;  %v842_v29 = vsel %vm432_vm2, %v841_v21, %v828_v12  ;;  %v781_v31 = vsel %vm432_vm2, %v780_v23, %v716_v16  ;;  %v786_v32 = vsel %vm432_vm2, %v721_v14, %v710_v13  ;;  %901 = vmatpush.bf16.xpose.msrb.mxu2 %v892_v27 }
 0x139   : > { %v720_v30 = vsel %vm432_vm2, 0.0, %v719_v22  ;;  %v867_v33 = vsel %vm862_vm4, %v855_v28, 0  ;;  %v785_v34 = vperm.slane %v781_v31, %v1790_v18  ;;  %v846_v36 = vperm.slane %v842_v29, %v1801_v26 }
 0x13a   : > { %v792_v35 = vsel %vm432_vm2, %v791_v25, %v720_v30  ;;  %876 = vmatpush.bf16.xpose.msra.mxu3 %v867_v33  ;;  %v849_v37 = vrot.slane %v840_v20, 4  ;;  %v779_v40 = vperm.slane %v775_v24, %v1790_v18  ;;  %v790_v43 = vperm.slane %v786_v32, %v1790_v18 }
 0x13b   : > { %v796_v38 = vperm.slane %v792_v35, %v1790_v18  ;;  %v797_v41 = vrot.slane %v785_v34, 4  ;;  %v847_v42 = vrot.slane %v846_v36, 4  ;;  %v531_v15 = vrot.slane %v423_v3, 4 }
 0x13c   : > { %v850_v45 = vsel %vm432_vm2, %v846_v36, %v849_v37  ;;  %v536_v17 = vperm.slane %v423_v3, %v1790_v18 }
 0x13d   : > { %v803_v44 = vrot.slane %v796_v38, 4  ;;  %v798_v46 = vsel %vm432_vm2, %v797_v41, %v779_v40  ;;  %v848_v47 = vsel %vm432_vm2, %v847_v42, %v840_v20  ;;  %v854_v51 = vpack.c.bf16 %v850_v45, %v850_v45 }
 0x13e   : > { %v802_v48 = vperm.slane %v798_v46, %v1801_v26  ;;  %v852_v53 = vpack.c.bf16 %v848_v47, %v848_v47  ;;  %v425_v4 = vpop.f32.mrf.mxu1  ;;  %v532_v16 = vsel %vm432_vm2, 0.0, %v531_v15  ;;  %v553_v20 = vrot.slane %v536_v17, 4 }
 0x13f   : > { %v804_v49 = vsel %vm432_vm2, %v803_v44, %v790_v43  ;;  %v886_v58 = vunpack.c.l.b16 %v854_v51  ;;  %v540_v19 = vperm.slane %v532_v16, %v1790_v18 }
 0x140   : > { %v808_v50 = vperm.slane %v804_v49, %v1801_v26  ;;  %v811_v52 = vrot.slane %v802_v48, 4  ;;  %v860_v61 = vunpack.c.l.b16 %v852_v53 }
 0x141   : > { %v565_v23 = vrot.slane %v540_v19, 4 }
 0x142   : > { %v809_v54 = vrot.slane %v808_v50, 4  ;;  %v812_v56 = vsel %vm432_vm2, %v808_v50, %v811_v52 }
 0x143   : > { %v853_v57 = vpack.c.bf16 %v812_v56, %v812_v56 }
 0x144   : > { %v810_v59 = vsel %vm432_vm2, %v809_v54, %v802_v48 }
 0x145   : > { %v851_v60 = vpack.c.bf16 %v810_v59, %v810_v59  ;;  %v885_v63 = vunpack.c.l.b16 %v853_v57 }
 0x147   : > { %v859_v0 = vunpack.c.l.b16 %v851_v60  ;;  %v887_v1 = vpack.c.b16 %v886_v58, %v885_v63 }
 0x149   : > { %v861_v2 = vpack.c.b16 %v860_v61, %v859_v0  ;;  %1412 = vmatmul.msk.bf16.vlgmr.msrb.gmra.mxu2 %vm862_vm4, %v887_v1 }
 0x14b   : > { %1411 = vmatmul.msk.bf16.vlgmr.msra.gmra.mxu3 %vm862_vm4, %v861_v2 }
 0x1a9   : > { %v529_v21 = vpop.permute.xlu0 %528 }
 0x1aa   : > { %v541_v22 = vrot.slane %v529_v21, 4  ;;  %v546_v62 = vperm.slane %v529_v21, %v1790_v18 }
 0x1ac   : > { %v542_v24 = vsel %vm432_vm2, 0.0, %v541_v22  ;;  %v551_v25 = vrot.slane %v546_v62, 4  ;;  %v554_v27 = vsel %vm432_vm2, %v546_v62, %v553_v20 }
 0x1ad   : > { %v550_v28 = vperm.slane %v542_v24, %v1790_v18  ;;  %v562_v29 = vperm.slane %v554_v27, %v1801_v26 }
 0x1ae   : > { %v552_v30 = vsel %vm432_vm2, %v551_v25, %v536_v17 }
 0x1af   : > { %v558_v31 = vperm.slane %v552_v30, %v1801_v26  ;;  %v563_v32 = vrot.slane %v550_v28, 4  ;;  %v566_v33 = vsel %vm432_vm2, %v550_v28, %v565_v23  ;;  %v577_v34 = vrot.slane %v562_v29, 4 }
 0x1b0   : > { %v574_v35 = vperm.slane %v566_v33, %v1801_v26 }
 0x1b1   : > { %v564_v36 = vsel %vm432_vm2, %v563_v32, %v540_v19  ;;  %v575_v37 = vrot.slane %v558_v31, 4  ;;  %v578_v38 = vsel %vm432_vm2, 0.0, %v577_v34  ;;  %v583_v42 = vsel %vm432_vm2, %v577_v34, %v558_v31 }
 0x1b2   : > { %v570_v40 = vperm.slane %v564_v36, %v1801_v26  ;;  %v581_v41 = vrot.slane %v574_v35, 4  ;;  %v588_v43 = vrot.slane %v578_v38, 4  ;;  %v587_v48 = vperm.slane %v583_v42, %v1790_v18 }
 0x1b3   : > { %v576_v44 = vsel %vm432_vm2, 0.0, %v575_v37 }
 0x1b4   : > { %v579_v45 = vrot.slane %v570_v40, 4  ;;  %v582_v46 = vsel %vm432_vm2, 0.0, %v581_v41  ;;  %v589_v47 = vsel %vm432_vm2, %v588_v43, %v576_v44  ;;  %v594_v50 = vsel %vm432_vm2, %v581_v41, %v570_v40 }
 0x1b5   : > { %v593_v49 = vperm.slane %v589_v47, %v1790_v18  ;;  %v599_v51 = vrot.slane %v582_v46, 4  ;;  %v598_v56 = vperm.slane %v594_v50, %v1790_v18 }
 0x1b6   : > { %v580_v52 = vsel %vm432_vm2, 0.0, %v579_v45 }
 0x1b7   : > { %v600_v53 = vsel %vm432_vm2, %v599_v51, %v580_v52  ;;  %v605_v54 = vrot.slane %v593_v49, 4 }
 0x1b8   : > { %v604_v57 = vperm.slane %v600_v53, %v1790_v18 }
 0x1b9   : > { %v606_v58 = vsel %vm432_vm2, %v605_v54, %v587_v48 }
 0x1ba   : > { %v610_v59 = vperm.slane %v606_v58, %v1801_v26  ;;  %v611_v60 = vrot.slane %v604_v57, 4 }
 0x1bc   : > { %v612_v61 = vsel %vm432_vm2, %v611_v60, %v598_v56  ;;  %v619_v63 = vrot.slane %v610_v59, 4 }
 0x1bd   : > { %v616_v0 = vperm.slane %v612_v61, %v1801_v26 }
 0x1bf   : > { %v617_v1 = vrot.slane %v616_v0, 4  ;;  %v620_v2 = vsel %vm432_vm2, %v616_v0, %v619_v63 }
 0x1c0   : > { %v622_v3 = vpack.c.bf16 %v620_v2, %v620_v2 }
 0x1c1   : > { %v618_v4 = vsel %vm432_vm2, %v617_v1, %v610_v59 }
 0x1c2   : > { %624 = vst.msk [vmem:[#allocation3 + $0x4] sm:$0xf] %vm524_vm3, %v622_v3 }
 0x1cc   : > { %v903_v5 = vpop.f32.mrf.mxu2 }
 0x1cd   : > { %v1917_v6 = vmul.f32 0.25, %v903_v5  ;;  %v621_v5 = vpack.c.bf16 %v618_v4, %v618_v4 }
 0x1ce   : > { %v878_v7 = vpop.f32.mrf.mxu3 }
 0x1cf   : > { %v1919_v39 = vmul.f32 0.25, %v878_v7  ;;  %v919_v55 = vsel %vm912_vm5, %v1917_v6, -inf  ;;  %623 = vst.msk [vmem:[#allocation3] sm:$0xf] %vm524_vm3, %v621_v5 }
 0x1d0   : > { %920 = vmax.xlane.f32.xlu2 %v919_v55 }
 0x1d1   : > { %v913_v8 = vsel %vm912_vm5, %v1919_v39, -inf }
 0x1d2   : > { %914 = vmax.xlane.f32.xlu1 %v913_v8  ;;  %v962_v8 = vld [vmem:[#allocation3 + $0x4] sm:$0xf] }
 0x1d4   : > { %v905_v9 = vpop.f32.mrf.mxu2 }
 0x1d5   : > { %v1925_v10 = vmul.f32 0.25, %v905_v9  ;;  %v998_v9 = vsel %vm971_vm6, %v962_v8, 0 }
 0x1d6   : > { %v880_v11 = vpop.f32.mrf.mxu3  ;;  %v961_v7 = vld [vmem:[#allocation3] sm:$0xf]  ;;  %1007 = vmatpush.bf16.msrb.mxu0 %v998_v9 }
 0x1d7   : > { %v1927_v12 = vmul.f32 0.25, %v880_v11  ;;  %v922_v13 = vsel %vm912_vm5, %v1925_v10, -inf  ;;  %v973_v55 = vsel %vm971_vm6, %v961_v7, 0 }
 0x1d8   : > { %923 = vmax.xlane.f32.xlu2 %v922_v13  ;;  %982 = vmatpush.bf16.msrb.mxu3 %v973_v55  ;;  %v1439_v55 = vld [vmem:[#allocation4 + $0x8] sm:$0xff] }
 0x1d9   : > { %v916_v14 = vsel %vm912_vm5, %v1927_v12, -inf  ;;  %1234 = vmatpush.bf16.msrb.mxu1 %v1439_v55 }
 0x1da   : > { %917 = vmax.xlane.f32.xlu1 %v916_v14 }
 0x243   : > { %v921_v11 = vpop.xlane.xlu2 %920 }
 0x244   : > { %v927_v13 = vsub.f32 %v1917_v6, %v921_v11 }
 0x245   : > { %v915_v14 = vpop.xlane.xlu1 %914 }
 0x246   : > { %v925_v15 = vsub.f32 %v1919_v39, %v915_v14  ;;  %v933_v16 = vmul.f32 1.442695, %v927_v13 }
 0x248   : > { %v929_v17 = vmul.f32 1.442695, %v925_v15  ;;  %1526 = vpow2.f32 %v933_v16  ;;  %v1438_v15 = vld [vmem:[#allocation4] sm:$0xff] }
 0x249   : > { %1235 = vmatpush.bf16.msrb.mxu1 %v1438_v15 }
 0x24a   : > { %1528 = vpow2.f32 %v929_v17 }
 0x24b   : > { %v924_v19 = vpop.xlane.xlu2 %923 }
 0x24c   : > { %v928_v20 = vsub.f32 %v1925_v10, %v924_v19 }
 0x24d   : > { %v918_v21 = vpop.xlane.xlu1 %917 }
 0x24e   : > { %v926_v22 = vsub.f32 %v1927_v12, %v918_v21  ;;  %v1527_v62 = vpop.eup %1526  ;;  %v935_v23 = vmul.f32 1.442695, %v928_v20 }
 0x24f   : > { %v943_v27 = vsel %vm912_vm5, %v1527_v62, 0.0 }
 0x250   : > { %v1529_v24 = vpop.eup %1528  ;;  %v931_v25 = vmul.f32 1.442695, %v926_v22  ;;  %1530 = vpow2.f32 %v935_v23  ;;  %944 = vadd.xlane.f32.xlu0 %v943_v27 }
 0x251   : > { %v937_v6 = vsel %vm912_vm5, %v1529_v24, 0.0 }
 0x252   : > { %1532 = vpow2.f32 %v931_v25  ;;  %938 = vadd.xlane.f32.xlu1 %v937_v6 }
 0x256   : > { %v1531_v39 = vpop.eup %1530 }
 0x257   : > { %v946_v29 = vsel %vm912_vm5, %v1531_v39, 0.0 }
 0x258   : > { %v1533_v28 = vpop.eup %1532 }
 0x259   : > { %v940_v10 = vsel %vm912_vm5, %v1533_v28, 0.0 }
 0x25a   : > { %947 = vadd.xlane.f32.xlu1 %v946_v29  ;;  %941 = vadd.xlane.f32.xlu2 %v940_v10 }
 0x2c3   : > { %v945_v30 = vpop.xlane.xlu0 %944 }
 0x2c5   : > { %v939_v12 = vpop.xlane.xlu1 %938 }
 0x2c6   : > { %1534 = vrcp.f32 %v939_v12 }
 0x2c7   : > { %1536 = vrcp.f32 %v945_v30 }
 0x2cc   : > { %v1535_v33 = vpop.eup %1534 }
 0x2cd   : > { %v942_v31 = vpop.xlane.xlu2 %941  ;;  %v948_v32 = vpop.xlane.xlu1 %947  ;;  %v953_v35 = vmul.f32 %v1535_v33, %v1529_v24 }
 0x2ce   : > { %1538 = vrcp.f32 %v942_v31  ;;  %v1537_v34 = vpop.eup %1536 }
 0x2cf   : > { %1540 = vrcp.f32 %v948_v32  ;;  %v955_v36 = vmul.f32 %v1537_v34, %v1527_v62  ;;  %v957_v40 = vpack.c.bf16 %v953_v35, %v953_v35 }
 0x2d1   : > { %v959_v42 = vpack.c.bf16 %v955_v36, %v955_v36  ;;  %v965_v46 = vunpack.c.l.b16 %v957_v40 }
 0x2d3   : > { %v991_v48 = vunpack.c.l.b16 %v959_v42 }
 0x2d4   : > { %v1539_v37 = vpop.eup %1538 }
 0x2d5   : > { %v1541_v38 = vpop.eup %1540  ;;  %v954_v41 = vmul.f32 %v1539_v37, %v1533_v28 }
 0x2d6   : > { %v956_v43 = vmul.f32 %v1541_v38, %v1531_v39 }
 0x2d7   : > { %v958_v44 = vpack.c.bf16 %v954_v41, %v954_v41 }
 0x2d8   : > { %v960_v45 = vpack.c.bf16 %v956_v43, %v956_v43 }
 0x2d9   : > { %v966_v47 = vunpack.c.l.b16 %v958_v44 }
 0x2da   : > { %v992_v49 = vunpack.c.l.b16 %v960_v45 }
 0x2db   : > { %v967_v50 = vpack.c.b16 %v966_v47, %v965_v46 }
 0x2dc   : > { %v993_v51 = vpack.c.b16 %v992_v49, %v991_v48 }
 0x2dd   : > { %1413 = vmatmul.msk.bf16.vlgmr.msrb.gmra.mxu3 %vm912_vm5, %v967_v50 }
 0x2de   : > { %1414 = vmatmul.msk.bf16.vlgmr.msrb.gmra.mxu0 %vm912_vm5, %v993_v51 }
 0x35b   : > { %v1009_v52 = vpop.f32.mrf.mxu0 }
 0x35c   : > { %v1024_v53 = vrot.slane %v1009_v52, 4  ;;  %v1029_v54 = vperm.slane %v1009_v52, %v1790_v18 }
 0x35e   : > { %v1025_v56 = vsel %vm432_vm2, 0.0, %v1024_v53  ;;  %v1034_v59 = vrot.slane %v1029_v54, 4 }
 0x35f   : > { %v1033_v57 = vperm.slane %v1025_v56, %v1790_v18 }
 0x360   : > { %v984_v58 = vpop.f32.mrf.mxu3 }
 0x361   : > { %v1014_v60 = vrot.slane %v984_v58, 4  ;;  %v1019_v61 = vperm.slane %v984_v58, %v1790_v18  ;;  %v1046_v3 = vrot.slane %v1033_v57, 4 }
 0x363   : > { %v1015_v63 = vsel %vm432_vm2, 0.0, %v1014_v60  ;;  %v1035_v0 = vsel %vm432_vm2, %v1034_v59, %v1019_v61  ;;  %v1036_v1 = vrot.slane %v1019_v61, 4  ;;  %v1011_v2 = vpop.f32.mrf.mxu0 }
 0x364   : > { %v1023_v4 = vperm.slane %v1015_v63, %v1790_v18  ;;  %v1041_v5 = vperm.slane %v1035_v0, %v1801_v26  ;;  %v1076_v7 = vrot.slane %v1011_v2, 4  ;;  %v1081_v14 = vperm.slane %v1011_v2, %v1790_v18 }
 0x365   : > { %v1037_v8 = vsel %vm432_vm2, %v1029_v54, %v1036_v1 }
 0x366   : > { %v1045_v9 = vperm.slane %v1037_v8, %v1801_v26  ;;  %v1047_v11 = vsel %vm432_vm2, %v1046_v3, %v1023_v4  ;;  %v1048_v13 = vrot.slane %v1023_v4, 4  ;;  %v1058_v17 = vrot.slane %v1041_v5, 4 }
 0x367   : > { %v1053_v16 = vperm.slane %v1047_v11, %v1801_v26  ;;  %v1077_v19 = vsel %vm432_vm2, 0.0, %v1076_v7  ;;  %v1086_v6 = vrot.slane %v1081_v14, 4 }
 0x368   : > { %v1049_v20 = vsel %vm432_vm2, %v1033_v57, %v1048_v13  ;;  %v1060_v21 = vrot.slane %v1045_v9, 4  ;;  %v986_v22 = vpop.f32.mrf.mxu3  ;;  %v1085_v23 = vperm.slane %v1077_v19, %v1790_v18  ;;  %v1059_v39 = vsel %vm432_vm2, 0.0, %v1058_v17 }
 0x369   : > { %v1057_v62 = vperm.slane %v1049_v20, %v1801_v26  ;;  %v1066_v24 = vrot.slane %v986_v22, 4  ;;  %v1071_v25 = vperm.slane %v986_v22, %v1790_v18  ;;  %v1062_v28 = vrot.slane %v1053_v16, 4 }
 0x36a   : > { %v1061_v27 = vsel %vm432_vm2, 0.0, %v1060_v21  ;;  %v1118_v12 = vsel %vm432_vm2, %v1060_v21, %v1041_v5  ;;  %v1098_v35 = vrot.slane %v1085_v23, 4 }
 0x36b   : > { %v1064_v29 = vrot.slane %v1057_v62, 4  ;;  %v1123_v10 = vrot.slane %v1061_v27, 4  ;;  %v1067_v30 = vsel %vm432_vm2, 0.0, %v1066_v24  ;;  %v1087_v31 = vsel %vm432_vm2, %v1086_v6, %v1071_v25 }
 0x36c   : > { %v1088_v32 = vrot.slane %v1071_v25, 4  ;;  %v1075_v36 = vperm.slane %v1067_v30, %v1790_v18  ;;  %v1093_v41 = vperm.slane %v1087_v31, %v1801_v26  ;;  %v1063_v42 = vsel %vm432_vm2, 0.0, %v1062_v28 }
 0x36d   : > { %v1065_v33 = vsel %vm432_vm2, 0.0, %v1064_v29  ;;  %v1124_v34 = vsel %vm432_vm2, %v1123_v10, %v1059_v39  ;;  %v1129_v46 = vsel %vm432_vm2, %v1064_v29, %v1053_v16  ;;  %v1122_v56 = vperm.slane %v1118_v12, %v1790_v18 }
 0x36e   : > { %v1128_v37 = vperm.slane %v1124_v34, %v1790_v18  ;;  %v1134_v38 = vrot.slane %v1065_v33, 4  ;;  %v1089_v40 = vsel %vm432_vm2, %v1081_v14, %v1088_v32  ;;  %v1099_v44 = vsel %vm432_vm2, %v1098_v35, %v1075_v36 }
 0x36f   : > { %v1097_v43 = vperm.slane %v1089_v40, %v1801_v26  ;;  %v1100_v45 = vrot.slane %v1075_v36, 4  ;;  %v1105_v48 = vperm.slane %v1099_v44, %v1801_v26  ;;  %v1110_v51 = vrot.slane %v1093_v41, 4 }
 0x370   : > { %v1140_v47 = vrot.slane %v1128_v37, 4  ;;  %v1135_v49 = vsel %vm432_vm2, %v1134_v38, %v1063_v42  ;;  %v1133_v58 = vperm.slane %v1129_v46, %v1790_v18 }
 0x371   : > { %v1101_v50 = vsel %vm432_vm2, %v1085_v23, %v1100_v45  ;;  %v1112_v52 = vrot.slane %v1097_v43, 4  ;;  %v1139_v53 = vperm.slane %v1135_v49, %v1790_v18  ;;  %v1114_v60 = vrot.slane %v1105_v48, 4 }
 0x372   : > { %v1109_v54 = vperm.slane %v1101_v50, %v1801_v26  ;;  %v1111_v0 = vsel %vm432_vm2, 0.0, %v1110_v51  ;;  %v1141_v1 = vsel %vm432_vm2, %v1140_v47, %v1122_v56 }
 0x373   : > { %v1113_v57 = vsel %vm432_vm2, 0.0, %v1112_v52  ;;  %v1146_v59 = vrot.slane %v1139_v53, 4  ;;  %v1156_v4 = vsel %vm432_vm2, %v1112_v52, %v1093_v41  ;;  %v1115_v9 = vsel %vm432_vm2, 0.0, %v1114_v60 }
 0x374   : > { %v1116_v61 = vrot.slane %v1109_v54, 4  ;;  %v1161_v63 = vrot.slane %v1113_v57, 4  ;;  %v1145_v11 = vperm.slane %v1141_v1, %v1801_v26  ;;  %v1160_v14 = vperm.slane %v1156_v4, %v1790_v18 }
 0x375   : > { %v1147_v2 = vsel %vm432_vm2, %v1146_v59, %v1133_v58 }
 0x376   : > { %v1117_v3 = vsel %vm432_vm2, 0.0, %v1116_v61  ;;  %v1162_v5 = vsel %vm432_vm2, %v1161_v63, %v1111_v0  ;;  %v1151_v7 = vperm.slane %v1147_v2, %v1801_v26  ;;  %v1167_v15 = vsel %vm432_vm2, %v1116_v61, %v1105_v48 }
 0x377   : > { %v1166_v55 = vperm.slane %v1162_v5, %v1790_v18  ;;  %v1172_v8 = vrot.slane %v1117_v3, 4  ;;  %v1171_v22 = vperm.slane %v1167_v15, %v1790_v18  ;;  %v1154_v24 = vrot.slane %v1145_v11, 4 }
 0x378   : > { %v1152_v13 = vrot.slane %v1151_v7, 4 }
 0x379   : > { %v1173_v16 = vsel %vm432_vm2, %v1172_v8, %v1115_v9  ;;  %v1178_v17 = vrot.slane %v1166_v55, 4  ;;  %v1155_v39 = vsel %vm432_vm2, %v1151_v7, %v1154_v24 }
 0x37a   : > { %v1177_v19 = vperm.slane %v1173_v16, %v1790_v18  ;;  %v1153_v20 = vsel %vm432_vm2, %v1152_v13, %v1145_v11 }
 0x37b   : > { %v1179_v21 = vsel %vm432_vm2, %v1178_v17, %v1160_v14 }
 0x37c   : > { %v1183_v62 = vperm.slane %v1179_v21, %v1801_v26  ;;  %v1184_v23 = vrot.slane %v1177_v19, 4 }
 0x37e   : > { %v1185_v25 = vsel %vm432_vm2, %v1184_v23, %v1171_v22  ;;  %v1192_v27 = vrot.slane %v1183_v62, 4 }
 0x37f   : > { %v1189_v6 = vperm.slane %v1185_v25, %v1801_v26  ;;  %v1525_v26 = vld [vmem:[%s2092_s6] ss:$0 sm:$0xff] }
 0x381   : > { %v1193_v28 = vsel %vm432_vm2, %v1189_v6, %v1192_v27  ;;  %v1190_v29 = vrot.slane %v1189_v6, 4 }
 0x382   : > { %v1520_v10 = vpack.i.bf16 %v1193_v28, %v1155_v39 }
 0x383   : > { %v1191_v12 = vsel %vm432_vm2, %v1190_v29, %v1183_v62 }
 0x384   : > { %1521 = vrot.lane.b32.xlu2 %v1520_v10, %s1662_s20 }
 0x3de   : > { %v1522_v18 = vpop.permute.xlu2 %1521 }
 0x3df   : > { %v1524_v30 = vunpack.i.h.bf16 %v1522_v18  ;;  %v1523_v31 = vunpack.i.l.bf16 %v1522_v18 }
 0x3e1   : > { %v1202_v32 = vsel %vm862_vm4, %v1153_v20, %v1523_v31  ;;  %v1203_v33 = vsel %vm862_vm4, %v1191_v12, %v1524_v30 }
 0x3e2   : > { %v1204_v34 = vpack.c.bf16 %v1203_v33, %v1202_v32 }
 0x3e4   : > { %1423 = vmatmul.msk.bf16.vlgmr.msrb.gmra.mxu1 %vm644_vm0, %v1204_v34 }
 0x461   : > { %v1237_v35 = vpop.f32.mrf.mxu1 }
 0x462   : > { %v1238_v36 = vadd.f32 %v1525_v26, %v1237_v35 }
 0x464   : > { %1242 = vst.msk [vmem:[%s326_s12] sm:$0xff] %vm644_vm0, %v1238_v36 }
 0x469   : > { %v1239_v37 = vpop.f32.mrf.mxu1 }
 0x46a   : > { %v1240_v38 = vadd.f32 %v1525_v26, %v1239_v37 }
 0x46c   : > { %1243 = vst.msk [vmem:[%s326_s12 + $0x8] sm:$0xff] %vm644_vm0, %v1240_v38 }
 0x46d   : > { %1599 = shalt.err (!%p1596_p9)
}
 0x46e   : > { %s1663_s21 = smov 128   ;;  %s1664_s12 = smov 8  }
 0x46f   : > { %1445 = dma.vmem_to_hbm [thread:$0]  (%p1745_p4), %s1260_s16, 256, %s1262_s18, %s1245_s17, %s1663_s21, %s1663_s21, %s1664_s12  }
 0x470 PF: > { %p1457_p10 = scmp.ge.s32.totalorder %s1654_s29, 2  ;;  %s1276_s5 = sand.u32 1, %s1634_s24  }
 0x471   : > { %s1277_s10 = scalar_lea.sflag [#allocation6], %s1276_s5 }
 0x472   : > { %p1452_p11 = pnand %p1457_p10, %p1752_p8 }
 0x474   : > { %p1453_p12 = pneg %p1452_p11 }
 0x476   : > { %1629 = dma.done.wait (%p1453_p12), %s1277_s10, 256  }
 0x477   : > { %1631 = vsyncadd (%p1453_p12), %s1277_s10, 4294967040  ;;  %s21_s29 = sadd.s32 1, %s1654_s29   ;;  %s2098_s24 = smov %s1638_s25 }
 0x478   : > { %p18_p13 = scmp.ge.s32.totalorder %s21_s29, 4   ;;  %s2099_s25 = smov %s1642_s26 }
 0x479   : > { %s2100_s26 = smov %s1758_s14  ;;  %s2101_s27 = smov %s1650_s28 }
 0x47a   : > { %s2102_s28 = smov %s2104_s9  ;;  %20 = sbr.rel (!%p18_p13) target bundleno = 7 (0x7), region = 95 }
 0x47f   :  { %1283 = vsyncpa [#allocation5], 1 }
 0x480   :  { %1285 = vsyncpa [#allocation5 + $0x1], 1 }
 0x481   :  { %1286 = vsyncpa [#allocation6], 1 }
 0x482   :  { %1288 = vsyncpa [#allocation6 + $0x1], 1 }

</bundles_post_ra>
